<compile_context>
chip_gen: v7x
topology: tpu7x:2x2x1
jax: 0.10.0
libtpu: 0.0.40
codegen_flags: <defaults>
</compile_context>

<pallas_src>
import jax
import jax.numpy as jnp
from jax.experimental import pallas as pl
from jax.experimental.pallas import tpu as pltpu


_VMEM_LIMIT_BYTES = 32 * 1024 * 1024      # explicit scoped-VMEM limit (safe on v5e/v6e/v7x)
_VMEM_TILE_BUDGET = 24 * 1024 * 1024      # budget used when sizing tile_m
_STREAM_TARGET_BYTES = 2 * 1024 * 1024    # target q+c bytes streamed per grid step


def _round_up(x, n):
    return ((x + n - 1) // n) * n


def _choose_tile_m(m, dim, in_itemsize, act_row_bytes, weight_bytes):
    """Pick a row tile: big enough to amortize the ~0.35us/step overhead, small enough
    to fit the VMEM budget, and leaving >= 2 grid steps for v7x's two TensorCores."""
    per_row_stream = max(2 * dim * in_itemsize, 1)
    t = max(1024, _STREAM_TARGET_BYTES // per_row_stream)
    # Per-row VMEM residency: double-buffered q/c input blocks + double-buffered output
    # rows + compiler temporaries for the activations.
    per_row_vmem = 2 * (2 * dim * in_itemsize) + 2 * (2 * 4) + act_row_bytes
    avail = _VMEM_TILE_BUDGET - 2 * weight_bytes
    if avail > 128 * per_row_vmem:
        t = min(t, avail // per_row_vmem)
    else:
        t = 128
    # Guarantee >= 2 grid steps when there is enough work (megacore sharding on v7x).
    if m > 256:
        t = min(t, _round_up(-(-m // 2), 128))
    if t >= m:
        return m
    return max(128, (t // 128) * 128)


def _make_kernel(n_layers, compute_dtype):
    """Kernel body. Ref order: q, c, params..., out.

    params (all 2-D, grid-resident):
      n_layers == 1 : w_top (1,dim) f32, w_bot (1,dim) f32, b0 (1,1) f32
      n_layers  > 1 : w_top (dim,h0), w_bot (dim,h0) [compute dtype], b0 (1,h0) f32,
                      (w_l (h_{l-1},h_l) [compute dtype], b_l (1,h_l) f32) for hidden l>=1,
                      w_last (h_last,1) f32, b_last (1,1) f32
    out block: (2, tile_m) f32 — row 0 = logsigmoid(logits), row 1 = logsigmoid(-logits).
    """
    n_params = 3 + 2 * (n_layers - 1)

    def kernel(*refs):
        q_ref, c_ref = refs[0], refs[1]
        p = refs[2:2 + n_params]
        out_ref = refs[2 + n_params]

        if n_layers == 1:
            # Single Linear(2*dim -> 1): pure VPU math. Partial products in natural
            # layout (sublane-broadcast (1, dim) weights), then ONE transpose + sublane
            # reduce to get a lane-dense (1, tile_m) logits row.
            qf = q_ref[...].astype(jnp.float32)                       # (tile_m, dim)
            cf = c_ref[...].astype(jnp.float32)
            part = qf * p[0][...] + cf * p[1][...]                    # (tile_m, dim)
            logits = (jnp.sum(jnp.transpose(part), axis=0, keepdims=True)
                      + p[2][...])                                    # (1, tile_m)
        else:
            # Layer 0 with the concat folded into a split matmul (MXU, bf16 in / f32 acc).
            # Cast happens in-kernel so q/c never round-trip HBM in a second dtype.
            qc = q_ref[...].astype(compute_dtype)
            cc = c_ref[...].astype(compute_dtype)
            h = (jnp.dot(qc, p[0][...], preferred_element_type=jnp.float32)
                 + jnp.dot(cc, p[1][...], preferred_element_type=jnp.float32)
                 + p[2][...])
            h = jnp.maximum(h, 0.0)
            # Hidden layers 1 .. n_layers-2: bf16 MXU operands, f32 accumulation/bias/ReLU.
            for l in range(1, n_layers - 1):
                w = p[2 * l + 1][...]
                b = p[2 * l + 2][...]
                h = jnp.maximum(
                    jnp.dot(h.astype(compute_dtype), w,
                            preferred_element_type=jnp.float32) + b, 0.0)
            # Final Linear(h_last -> 1) as VPU multiply + sublane reduce on h^T: avoids an
            # N=1 MXU matmul and yields a lane-dense (1, tile_m) logits row for the store.
            ht = jnp.transpose(h)                                     # (h_last, tile_m)
            logits = jnp.sum(ht * p[-2][...], axis=0, keepdims=True) + p[-1][...]

        # Numerically stable logsigmoid: logsigmoid(x) = min(x, 0) - log1p(exp(-|x|)).
        stable = jnp.log1p(jnp.exp(-jnp.abs(logits)))
        out_ref[0:1, :] = jnp.minimum(logits, 0.0) - stable           # prob
        out_ref[1:2, :] = jnp.minimum(-logits, 0.0) - stable          # neg_prob

    return kernel


def should_copy_forward(query, context, weights, biases, *,
                        tile_m=None, compute_dtype=jnp.bfloat16):
    """Pallas implementation of ShouldCopy.forward.

    query, context: (..., dim) arrays with identical shape.
    weights: list of (in_l, out_l) arrays (layer 0 has in_0 == 2*dim, last out == 1).
    biases:  list of (out_l,) arrays.
    Returns (prob, neg_prob), each shaped query.shape[:-1], float32.
    """
    assert query.shape == context.shape
    lead_shape = query.shape[:-1]
    dim = query.shape[-1]
    n_layers = len(weights)
    assert n_layers >= 1 and len(biases) == n_layers
    assert weights[0].shape[0] == 2 * dim and weights[-1].shape[-1] == 1

    q = query.reshape(-1, dim)
    c = context.reshape(-1, dim)
    m = q.shape[0]

    act_dtype = compute_dtype if compute_dtype is not None else jnp.float32

    # Split the first-layer weight into query / context halves so the concat is never
    # materialized in HBM.
    w_top = weights[0][:dim]
    w_bot = weights[0][dim:]

    if n_layers == 1:
        params = [w_top.reshape(1, dim).astype(jnp.float32),
                  w_bot.reshape(1, dim).astype(jnp.float32),
                  biases[0].reshape(1, 1).astype(jnp.float32)]
        act_row_bytes = 3 * 4 * dim
    else:
        params = [w_top.astype(act_dtype),
                  w_bot.astype(act_dtype),
                  biases[0].reshape(1, -1).astype(jnp.float32)]
        for l in range(1, n_layers - 1):
            params += [weights[l].astype(act_dtype),
                       biases[l].reshape(1, -1).astype(jnp.float32)]
        params += [weights[-1].reshape(-1, 1).astype(jnp.float32),
                   biases[-1].reshape(1, 1).astype(jnp.float32)]
        max_h = max(w.shape[1] for w in weights[:-1])
        act_row_bytes = 4 * dim + 12 * max_h
        # NOTE: if profiling ever shows the layer-0 MXU matmul binding (large dim, h0<128),
        # zero-padding h0 to 128 raises MXU utilization; skipped here (HBM/step bound).

    weight_bytes = sum(int(p.size) * p.dtype.itemsize for p in params)

    # Row tiling; no jnp.pad — Pallas masks the partial last block (reads of the padded
    # region are undefined but per-row independent; their writes are dropped).
    if tile_m is None:
        tile_m = _choose_tile_m(m, dim, q.dtype.itemsize, act_row_bytes, weight_bytes)
    if tile_m >= m:
        tile_m = m
    else:
        assert tile_m % 128 == 0, "tile_m must be a multiple of 128 when tiling rows"
    grid = (pl.cdiv(m, tile_m),)

    in_specs = [pl.BlockSpec((tile_m, dim), lambda i: (i, 0)),
                pl.BlockSpec((tile_m, dim), lambda i: (i, 0))]
    # Weights / biases are resident across the whole grid (constant block index) — a
    # single buffer is enough, no double-buffering needed.
    for prm in params:
        in_specs.append(pl.BlockSpec(prm.shape, lambda i: (0, 0),
                                     pipeline_mode=pl.Buffered(1)))

    out = pl.pallas_call(
        _make_kernel(n_layers, act_dtype),
        grid_spec=pltpu.PrefetchScalarGridSpec(
            num_scalar_prefetch=0,
            grid=grid,
            in_specs=in_specs,
            out_specs=pl.BlockSpec((2, tile_m), lambda i: (0, i)),
        ),
        out_shape=jax.ShapeDtypeStruct((2, m), jnp.float32),
        compiler_params=pltpu.CompilerParams(
            dimension_semantics=("parallel",),
            vmem_limit_bytes=_VMEM_LIMIT_BYTES),
    )(q, c, *params)

    prob = out[0].reshape(lead_shape)
    neg_prob = out[1].reshape(lead_shape)
    return prob, neg_prob


def init_should_copy_params(key, dim, hidden_dims):
    """Deterministic init mirroring nn.Linear shapes: MLP(2*dim, hidden_dims, 1)."""
    all_dims = [2 * dim] + list(hidden_dims) + [1]
    weights, biases = [], []
    for i in range(len(all_dims) - 1):
        key, kw, kb = jax.random.split(key, 3)
        fan_in = all_dims[i]
        bound = 1.0 / jnp.sqrt(fan_in)
        # nn.Linear stores (out, in); we keep (in, out) for x @ W.
        w = jax.random.uniform(kw, (all_dims[i], all_dims[i + 1]),
                               minval=-bound, maxval=bound, dtype=jnp.float32)
        b = jax.random.uniform(kb, (all_dims[i + 1],),
                               minval=-bound, maxval=bound, dtype=jnp.float32)
        weights.append(w)
        biases.append(b)
    return weights, biases


def _reference_forward(query, context, weights, biases, compute_dtype=jnp.bfloat16):
    """Pure-JAX reference of ShouldCopy.forward, applying the same rounding as the kernel
    (bf16 MXU operands for all layers except the final ->1 layer; final layer and the
    single-Linear configuration stay f32)."""
    h = jnp.concatenate([query, context], axis=-1).astype(jnp.float32)
    n = len(weights)
    for i, (w, b) in enumerate(zip(weights, biases)):
        w32 = w.astype(jnp.float32)
        if compute_dtype is not None and n > 1 and i < n - 1:
            h = h.astype(compute_dtype).astype(jnp.float32)
            w32 = w.astype(compute_dtype).astype(jnp.float32)
        h = jnp.dot(h, w32, precision=jax.lax.Precision.HIGHEST) + b.astype(jnp.float32)
        if i < n - 1:
            h = jax.nn.relu(h)
    logits = jnp.squeeze(h, -1)
    return jax.nn.log_sigmoid(logits), jax.nn.log_sigmoid(-logits)


if __name__ == "__main__":
    def _check(B, N, dim, hidden_dims, tile_m, seed):
        key = jax.random.fold_in(jax.random.PRNGKey(0), seed)
        kq, kc, kp = jax.random.split(key, 3)
        query = jax.random.normal(kq, (B, N, dim), dtype=jnp.float32)
        context = jax.random.normal(kc, (B, N, dim), dtype=jnp.float32)
        weights, biases = init_should_copy_params(kp, dim, hidden_dims)

        prob, neg_prob = should_copy_forward(query, context, weights, biases,
                                             tile_m=tile_m)
        jax.block_until_ready((prob, neg_prob))

        ref_prob, ref_neg = _reference_forward(query, context, weights, biases)
        assert prob.shape == (B, N) and neg_prob.shape == (B, N)
        assert jnp.allclose(prob, ref_prob, atol=1e-4, rtol=1e-4)
        assert jnp.allclose(neg_prob, ref_neg, atol=1e-4, rtol=1e-4)

    # batch=2, seq=8, dim=16, one hidden layer of 32 (single clamped tile, auto tile_m).
    _check(2, 8, 16, [32], None, seed=0)
    # Module default: no hidden layers (single Linear(2*dim -> 1)), pure-VPU path.
    _check(2, 8, 16, [], None, seed=1)
    # Explicit multi-tile path with a partial last block (M=200, tile_m=128): exercises
    # the no-padding boundary masking.
    _check(2, 100, 16, [32], 128, seed=2)
    # Auto tile_m with M=400 (>256): forces >=2 grid steps, partial last block, 2 hidden
    # layers exercising the bf16 hidden-layer loop.
    _check(2, 200, 16, [32, 16], None, seed=3)

    print("KERNEL_OK")
</pallas_src>

<mosaic_0001>
module attributes {stable_mosaic.version = 11 : i64} {
  func.func @kernel(%arg0: i32, %arg1: memref<16x16xf32, #tpu.memory_space<vmem>>, %arg2: memref<16x16xf32, #tpu.memory_space<vmem>>, %arg3: memref<16x32xbf16, #tpu.memory_space<vmem>>, %arg4: memref<16x32xbf16, #tpu.memory_space<vmem>>, %arg5: memref<1x32xf32, #tpu.memory_space<vmem>>, %arg6: memref<32x1xf32, #tpu.memory_space<vmem>>, %arg7: memref<1x1xf32, #tpu.memory_space<vmem>>, %arg8: memref<2x16xf32, #tpu.memory_space<vmem>>) attributes {dimension_semantics = [#tpu.dimension_semantics<parallel>], iteration_bounds = array<i64: 1>, scalar_prefetch = 0 : i64, scratch_operands = 0 : i64, tpu.core_type = #tpu.core_type<tc>, window_params = [{transform_indices = @transform_0, window_bounds = array<i64: 16, 16>}, {transform_indices = @transform_1, window_bounds = array<i64: 16, 16>}, {pipeline_mode = #tpu.pipeline_mode<synchronous>, transform_indices = @transform_2, window_bounds = array<i64: 16, 32>}, {pipeline_mode = #tpu.pipeline_mode<synchronous>, transform_indices = @transform_3, window_bounds = array<i64: 16, 32>}, {pipeline_mode = #tpu.pipeline_mode<synchronous>, transform_indices = @transform_4, window_bounds = array<i64: 1, 32>}, {pipeline_mode = #tpu.pipeline_mode<synchronous>, transform_indices = @transform_5, window_bounds = array<i64: 32, 1>}, {pipeline_mode = #tpu.pipeline_mode<synchronous>, transform_indices = @transform_6, window_bounds = array<i64: 1, 1>}, {transform_indices = @transform_7, window_bounds = array<i64: 2, 16>}]} {
    %c0 = arith.constant 0 : index
    %c0_0 = arith.constant 0 : index
    %0 = vector.load %arg1[%c0, %c0_0] : memref<16x16xf32, #tpu.memory_space<vmem>>, vector<16x16xf32>
    %1 = arith.truncf %0 : vector<16x16xf32> to vector<16x16xbf16>
    %c0_1 = arith.constant 0 : index
    %c0_2 = arith.constant 0 : index
    %2 = vector.load %arg2[%c0_1, %c0_2] : memref<16x16xf32, #tpu.memory_space<vmem>>, vector<16x16xf32>
    %3 = arith.truncf %2 : vector<16x16xf32> to vector<16x16xbf16>
    %c0_3 = arith.constant 0 : index
    %c0_4 = arith.constant 0 : index
    %4 = vector.load %arg3[%c0_3, %c0_4] : memref<16x32xbf16, #tpu.memory_space<vmem>>, vector<16x32xbf16>
    %cst = arith.constant dense<0.000000e+00> : vector<16x32xf32>
    %5 = tpu.matmul %1, %4, %cst {dimension_numbers = #tpu.dot_dimension_numbers<[1], [0], [0], [1], [0, 0, 1, 1], [], []>} : vector<16x16xbf16>, vector<16x32xbf16>, vector<16x32xf32> -> vector<16x32xf32>
    %c0_5 = arith.constant 0 : index
    %c0_6 = arith.constant 0 : index
    %6 = vector.load %arg4[%c0_5, %c0_6] : memref<16x32xbf16, #tpu.memory_space<vmem>>, vector<16x32xbf16>
    %cst_7 = arith.constant dense<0.000000e+00> : vector<16x32xf32>
    %7 = tpu.matmul %3, %6, %cst_7 {dimension_numbers = #tpu.dot_dimension_numbers<[1], [0], [0], [1], [0, 0, 1, 1], [], []>} : vector<16x16xbf16>, vector<16x32xbf16>, vector<16x32xf32> -> vector<16x32xf32>
    %8 = arith.addf %5, %7 : vector<16x32xf32>
    %c0_8 = arith.constant 0 : index
    %c0_9 = arith.constant 0 : index
    %9 = vector.load %arg5[%c0_8, %c0_9] : memref<1x32xf32, #tpu.memory_space<vmem>>, vector<1x32xf32>
    %10 = vector.broadcast %9 : vector<1x32xf32> to vector<16x32xf32>
    %11 = arith.addf %8, %10 : vector<16x32xf32>
    %cst_10 = arith.constant 0.000000e+00 : f32
    %12 = vector.broadcast %cst_10 : f32 to vector<16x32xf32>
    %13 = arith.maximumf %11, %12 : vector<16x32xf32>
    %14 = tpu.transpose %13, [1, 0] : vector<16x32xf32> -> vector<32x16xf32>
    %c0_11 = arith.constant 0 : index
    %c0_12 = arith.constant 0 : index
    %15 = vector.load %arg6[%c0_11, %c0_12] : memref<32x1xf32, #tpu.memory_space<vmem>>, vector<32x1xf32>
    %16 = vector.broadcast %15 : vector<32x1xf32> to vector<32x16xf32>
    %17 = arith.mulf %14, %16 : vector<32x16xf32>
    %cst_13 = arith.constant dense<0.000000e+00> : vector<16xf32>
    %18 = vector.multi_reduction <add>, %17, %cst_13 [0] : vector<32x16xf32> to vector<16xf32>
    %19 = vector.shape_cast %18 : vector<16xf32> to vector<1x16xf32>
    %c0_14 = arith.constant 0 : index
    %c0_15 = arith.constant 0 : index
    %20 = vector.load %arg7[%c0_14, %c0_15] : memref<1x1xf32, #tpu.memory_space<vmem>>, vector<1x1xf32>
    %21 = vector.broadcast %20 : vector<1x1xf32> to vector<1x16xf32>
    %22 = arith.addf %19, %21 : vector<1x16xf32>
    %23 = math.absf %22 : vector<1x16xf32>
    %cst_16 = arith.constant 0.000000e+00 : f32
    %24 = vector.broadcast %cst_16 : f32 to vector<1x16xf32>
    %25 = arith.subf %24, %23 : vector<1x16xf32>
    %26 = math.exp %25 : vector<1x16xf32>
    %27 = math.log1p %26 : vector<1x16xf32>
    %cst_17 = arith.constant 0.000000e+00 : f32
    %28 = vector.broadcast %cst_17 : f32 to vector<1x16xf32>
    %29 = arith.minimumf %22, %28 : vector<1x16xf32>
    %30 = arith.subf %29, %27 : vector<1x16xf32>
    %c0_18 = arith.constant 0 : index
    %c0_19 = arith.constant 0 : index
    %31 = vector.load %arg8[%c0_18, %c0_19] : memref<2x16xf32, #tpu.memory_space<vmem>>, vector<1x16xf32>
    tpu.vector_store %arg8[%c0_18, %c0_19], %30 {strides = array<i32>} : memref<2x16xf32, #tpu.memory_space<vmem>>, vector<1x16xf32>,
    %cst_20 = arith.constant 0.000000e+00 : f32
    %32 = vector.broadcast %cst_20 : f32 to vector<1x16xf32>
    %33 = arith.subf %32, %22 : vector<1x16xf32>
    %cst_21 = arith.constant 0.000000e+00 : f32
    %34 = vector.broadcast %cst_21 : f32 to vector<1x16xf32>
    %35 = arith.minimumf %33, %34 : vector<1x16xf32>
    %36 = arith.subf %35, %27 : vector<1x16xf32>
    %c1 = arith.constant 1 : index
    %c0_22 = arith.constant 0 : index
    %37 = vector.load %arg8[%c1, %c0_22] : memref<2x16xf32, #tpu.memory_space<vmem>>, vector<1x16xf32>
    tpu.vector_store %arg8[%c1, %c0_22], %36 {strides = array<i32>} : memref<2x16xf32, #tpu.memory_space<vmem>>, vector<1x16xf32>,
    return
  }
  func.func @transform_0(%arg0: i32) -> (i32, i32) {
    %c0_i32 = arith.constant 0 : i32
    %c0_i32_0 = arith.constant 0 : i32
    return %arg0, %c0_i32 : i32, i32
  }
  func.func @transform_1(%arg0: i32) -> (i32, i32) {
    %c0_i32 = arith.constant 0 : i32
    %c0_i32_0 = arith.constant 0 : i32
    return %arg0, %c0_i32 : i32, i32
  }
  func.func @transform_2(%arg0: i32) -> (i32, i32) {
    %c0_i32 = arith.constant 0 : i32
    %c0_i32_0 = arith.constant 0 : i32
    %c0_i32_1 = arith.constant 0 : i32
    return %c0_i32, %c0_i32_0 : i32, i32
  }
  func.func @transform_3(%arg0: i32) -> (i32, i32) {
    %c0_i32 = arith.constant 0 : i32
    %c0_i32_0 = arith.constant 0 : i32
    %c0_i32_1 = arith.constant 0 : i32
    return %c0_i32, %c0_i32_0 : i32, i32
  }
  func.func @transform_4(%arg0: i32) -> (i32, i32) {
    %c0_i32 = arith.constant 0 : i32
    %c0_i32_0 = arith.constant 0 : i32
    %c0_i32_1 = arith.constant 0 : i32
    return %c0_i32, %c0_i32_0 : i32, i32
  }
  func.func @transform_5(%arg0: i32) -> (i32, i32) {
    %c0_i32 = arith.constant 0 : i32
    %c0_i32_0 = arith.constant 0 : i32
    %c0_i32_1 = arith.constant 0 : i32
    return %c0_i32, %c0_i32_0 : i32, i32
  }
  func.func @transform_6(%arg0: i32) -> (i32, i32) {
    %c0_i32 = arith.constant 0 : i32
    %c0_i32_0 = arith.constant 0 : i32
    %c0_i32_1 = arith.constant 0 : i32
    return %c0_i32, %c0_i32_0 : i32, i32
  }
  func.func @transform_7(%arg0: i32) -> (i32, i32) {
    %c0_i32 = arith.constant 0 : i32
    %c0_i32_0 = arith.constant 0 : i32
    return %c0_i32, %arg0 : i32, i32
  }
}

</mosaic_0001>

<bundles_post_ra>
// kernel: tpu_custom_call.1
= control target key start
LH: loop header
LB: loop body
LE: loop exit
PB: predicated region body
PF: predicated region fallthrough
CT: control target
= control target key end

     0   :  { %s426_s0 = inlined_call_operand.vmem [shape: f32[16,16], index: 0, kind: input, shape index: {}]   ;;  %s427_s1 = inlined_call_operand.vmem [shape: f32[16,16], index: 1, kind: input, shape index: {}]   ;;  %s428_s2 = inlined_call_operand.vmem [shape: bf16[16,32], index: 2, kind: input, shape index: {}]   ;;  %s429_s3 = inlined_call_operand.vmem [shape: bf16[16,32], index: 3, kind: input, shape index: {}]   ;;  %s430_s4 = inlined_call_operand.vmem [shape: f32[1,32], index: 4, kind: input, shape index: {}]   ;;  %s431_s5 = inlined_call_operand.vmem [shape: f32[32,1], index: 5, kind: input, shape index: {}]   ;;  %s432_s6 = inlined_call_operand.<no memory space> [shape: f32[1,1], index: 6, kind: input, shape index: {}]   ;;  %s433_s7 = inlined_call_operand.hbm [shape: f32[2,16], index: 7, kind: output, shape index: {}]  }
   0x1   :  { %v12_v0 = vstv %s432_s6 }
   0x2   :  { %13 = vst [vmem:[#allocation2] sm:$0x1] %v12_v0 }
   0x3   :  { %v298_v1 = vld [vmem:[%s429_s3] sm:$0xff]   ;;  %v328_v2 = vmov 0.0   ;;  %vm329_vm0 = vmmov 0   ;;  %v34_v5 = vld [vmem:[%s427_s1 + $0x8] sm:$0xff]  ;;  %vm46_vm1 = vcmask 130048   ;;  %v186_v9 = vld [vmem:[%s431_s5 + $0x10] sm:$0xff] }
   0x4   :  { %280 = vmatprep.subr.bf16.mxu0 %v328_v2  ;;  %286 = vmatprep.subr.bf16.mxu1 %v328_v2  ;;  %v299_v3 = vld [vmem:[%s428_s2] sm:$0xff]   ;;  %v31_v8 = vld [vmem:[%s426_s0 + $0x8] sm:$0xff]  ;;  %v330_v11 = vmov 0  }
   0x5   :  { %281 = vmatpush3.bf16.msra.mxu0 %v298_v1  ;;  %282 = vmatprep.mubr.msk.bf16.mxu0 %vm329_vm0, %v328_v2  ;;  %v33_v4 = vld [vmem:[%s427_s1] sm:$0xff] }
   0x6   :  { %v30_v6 = vld [vmem:[%s426_s0] sm:$0xff]  ;;  %287 = vmatpush3.bf16.msra.mxu1 %v299_v3  ;;  %288 = vmatprep.mubr.msk.bf16.mxu1 %vm329_vm0, %v328_v2  ;;  %v35_v7 = vpack.c.bf16 %v34_v5, %v33_v4 }
   0x7   :  { %v32_v10 = vpack.c.bf16 %v31_v8, %v30_v6  ;;  %297 = vset.pattern.permute.xlu1 %v330_v11  ;;  %296 = vset.pattern.permute.xlu0 %v330_v11 }
   0x8   :  { %14 = vsyncpa [#allocation4], 0  ;;  %283 = vmatmul.mubr.msk.bf16.vlgmr.msra.gmra.mrb[0].mxu0 %vm46_vm1, %v35_v7  ;;  %200 = vperm.xlu1 %297, %v186_v9   ;;  %v187_v12 = vld [vmem:[%s431_s5 + $0x18] sm:$0xff]  ;;  %v184_v13 = vld [vmem:[%s431_s5] sm:$0xff]  ;;  %v231_v49 = vlaneseq  ;;  %vm251_vm3 = vcmask 122880  }
   0x9   :  { %289 = vmatmul.mubr.msk.bf16.vlgmr.msra.gmra.mrb[0].mxu1 %vm46_vm1, %v32_v10  ;;  %190 = vperm.xlu0 %296, %v184_v13   ;;  %v185_v14 = vld [vmem:[%s431_s5 + $0x8] sm:$0xff]  ;;  %v225_v15 = vld [vmem:[#allocation2] sm:$0x1] }
   0xa   :  { %v275_v18 = vld [vmem:[%s430_s4] ss:$0 sm:$0xff]  ;;  %v232_v52 = vshrl.u32 %v231_v49, 7  ;;  %s331_s4 = smov [#allocation3]  }
   0xb   :  { %s263_s5 = sshll.u32 %s331_s4, 4  ;;  %s264_s5 = int_to_ptr.vmem [resolvable:$true] %s263_s5 }
   0xc   :  { %205 = vperm.xlu1 %297, %v187_v12   ;;  %v233_v55 = vsub.s32 0, %v232_v52  ;;  %s304_s20 = scalar_lea.vmem %s264_s5, 32  ;;  %p309_p1 = scmp.lt.s32.totalorder %s264_s5, %s264_s5 }
   0xd   :  { %195 = vperm.xlu0 %296, %v185_v14   ;;  %p305_p0 = scmp.ne.s32.totalorder %s264_s5, %s304_s20  ;;  %p310_p2 = scmp.lt.s32.totalorder %s304_s20, %s304_s20 }
   0xf   :  { %p311_p3 = por %p310_p2, %p309_p1 }
  0x11   :  { %228 = vperm.xlu0 %296, %v225_v15   ;;  %p312_p4 = pnand %p311_p3, %p305_p0 }
  0x87   :  { %v201_v31 = vpop.permute.xlu1 %200 }
  0x88   :  { %v191_v33 = vpop.permute.xlu0 %190 }
  0x8b   :  { %v206_v32 = vpop.permute.xlu1 %205 }
  0x8c   :  { %v196_v35 = vpop.permute.xlu0 %195 }
  0x90   :  { %v229_v57 = vpop.permute.xlu0 %228 }
  0x91   :  { %v234_v59 = vrot.slane %v229_v57, %v233_v55 }
  0xdb   :  { %v84_v16 = vpop.f32.mrb[0].mxu0 }
  0xdc   :  { %v134_v17 = vpop.f32.mrb[0].mxu1  ;;  %v284_v19 = vpop.f32.mrb[1].mxu0 }
  0xdd   :  { %v135_v20 = vadd.f32 %v134_v17, %v84_v16  ;;  %v290_v21 = vpop.f32.mrb[1].mxu1  ;;  %v87_v22 = vpop.f32.mrb[2].mxu0 }
  0xde   :  { %v137_v23 = vpop.f32.mrb[2].mxu1  ;;  %v285_v24 = vpop.f32.mrb[3].mxu0 }
  0xdf   :  { %v148_v25 = vadd.f32 %v275_v18, %v135_v20  ;;  %v138_v26 = vadd.f32 %v137_v23, %v87_v22  ;;  %v291_v27 = vpop.f32.mrb[3].mxu1 }
  0xe1   :  { %v150_v28 = vmax.f32 %v148_v25, 0.0  ;;  %v149_v29 = vadd.f32 %v275_v18, %v138_v26 }
  0xe3   :  { %152 = vxpose.xlu1.b32.start [1/2] (short) (narrow) %v150_v28, 32  ;;  %v151_v30 = vmax.f32 %v149_v29, 0.0 }
  0xe7   :  { %153 = vxpose.xlu1.b32.end [2/2] (short) (narrow) %v151_v30, 32 }
 0x163   :  { %v168_v34 = vpop.trf.xlu1 }
 0x164   :  { %v208_v38 = vmul.f32 %v191_v33, %v168_v34 }
 0x166   :  { %v212_v42 = vsel %vm46_vm1, %v208_v38, 0.0 }
 0x167   :  { %v169_v36 = vpop.trf.xlu1 }
 0x168   :  { %v209_v37 = vmul.f32 %v196_v35, %v169_v36 }
 0x16a   :  { %v213_v40 = vsel %vm46_vm1, %v209_v37, 0.0 }
 0x16b   :  { %v170_v39 = vpop.trf.xlu1  ;;  %v214_v44 = vadd.f32 %v213_v40, %v212_v42 }
 0x16c   :  { %v210_v41 = vmul.f32 %v201_v31, %v170_v39 }
 0x16e   :  { %v215_v43 = vsel %vm46_vm1, %v210_v41, 0.0 }
 0x16f   :  { %v171_v45 = vpop.trf.xlu1  ;;  %v216_v47 = vadd.f32 %v215_v43, %v214_v44 }
 0x170   :  { %v211_v46 = vmul.f32 %v206_v32, %v171_v45 }
 0x172   :  { %v217_v48 = vsel %vm46_vm1, %v211_v46, 0.0 }
 0x173   :  { %v218_v50 = vadd.f32 %v217_v48, %v216_v47 }
 0x175   :  { %v219_v51 = vrot.slane %v218_v50, 4 }
 0x177   :  { %v220_v53 = vadd.f32 %v219_v51, %v218_v50 }
 0x179   :  { %v221_v54 = vrot.slane %v220_v53, 2 }
 0x17b   :  { %v222_v56 = vadd.f32 %v221_v54, %v220_v53 }
 0x17d   :  { %v223_v58 = vrot.slane %v222_v56, 1 }
 0x17f   :  { %v224_v60 = vadd.f32 %v223_v58, %v222_v56 }
 0x181   :  { %v235_v61 = vadd.f32 %v234_v59, %v224_v60 }
 0x183   :  { %v236_v62 = vand.u32 2147483647, %v235_v61  ;;  %v253_v6 = vsub.f32 0.0, %v235_v61  ;;  %v249_v10 = vmin.f32 %v235_v61, 0.0 }
 0x185   :  { %v237_v63 = vsub.f32 0.0, %v236_v62  ;;  %v254_v11 = vmin.f32 %v253_v6, 0.0 }
 0x187   :  { %v238_v0 = vmul.f32 1.442695, %v237_v63 }
 0x189   :  { %300 = vpow2.f32 %v238_v0 }
 0x193   :  { %v301_v1 = vpop.eup %300 }
 0x194   :  { %v240_v2 = vadd.f32 1.0, %v301_v1  ;;  %v243_v3 = vmul.f32 -0.5, %v301_v1  ;;  %v246_v5 = vand.u32 2147483647, %v301_v1 }
 0x196   :  { %302 = vlog2.f32 %v240_v2  ;;  %v244_v4 = vadd.f32 1.0, %v243_v3  ;;  %vm247_vm2 = vcmp.lt.f32.partialorder %v246_v5, 0.0004427343 }
 0x198   :  { %v245_v9 = vmul.f32 %v301_v1, %v244_v4 }
 0x1a0   :  { %v303_v7 = vpop.eup %302 }
 0x1a1   :  { %v242_v8 = vmul.f32 0.6931472, %v303_v7 }
 0x1a3   :  { %v248_v12 = vsel %vm247_vm2, %v245_v9, %v242_v8 }
 0x1a4   :  { %v250_v13 = vsub.f32 %v249_v10, %v248_v12  ;;  %v255_v14 = vsub.f32 %v254_v11, %v248_v12 }
 0x1a6   :  { %252 = vst.msk [vmem:[#allocation3] sm:$0x1] %vm251_vm3, %v250_v13  ;;  %256 = vst.msk [vmem:[#allocation3 + $0x1] sm:$0x1] %vm251_vm3, %v255_v14 }
 0x1a7   :  { %315 = shalt.err (!%p312_p4)
}
 0x1a8   :  { %s316_s23 = scalar_lea.hbm %s433_s7, 32 }
 0x1a9   :  { %p317_p5 = scmp.ne.s32.totalorder %s433_s7, %s316_s23  ;;  %p320_p6 = scmp.lt.u32.totalorder %s316_s23, %s433_s7 }
 0x1ab   :  { %p322_p7 = pnand %p320_p6, %p317_p5 }
 0x1ad   :  { %325 = shalt.err (!%p322_p7)
}
 0x1ae   :  { %266 = dma.vmem_to_hbm [thread:$0]  %s264_s5, 32, %s433_s7, [#allocation4]  }
 0x1af   :  { %326 = dma.done.wait [#allocation4], 32  }
 0x1b0   :  { %327 = vsyncadd [#allocation4], 4294967264 }
 0x1b1   :  { %270 = vsyncpa [#allocation4], 1 }

</bundles_post_ra>
